<compile_context>
chip_gen: v5e
topology: v5e:2x2
jax: 0.10.0
libtpu: 0.0.40
codegen_flags: <defaults>
</compile_context>

<pallas_src>
import jax
import jax.numpy as jnp
from jax.experimental import pallas as pl
from jax.experimental.pallas import tpu as pltpu


# ----------------------------- helpers --------------------------------------

def _round_up(n, m):
    return ((n + m - 1) // m) * m


def _padded_bytes(shape, dtype):
    """VMEM footprint of a tile: last dim rounded to 128 lanes, second-to-last
    to the dtype's native sublane multiple (8 f32 / 16 bf16 / 32 int8)."""
    it = jnp.dtype(dtype).itemsize
    sub = (8 * 4) // it
    dims = list(shape)
    dims[-1] = _round_up(int(dims[-1]), 128)
    if len(dims) >= 2:
        dims[-2] = _round_up(int(dims[-2]), sub)
    n = 1
    for d in dims:
        n *= int(d)
    return n * it


def prepare_mlp_params(params, compute_dtype=jnp.bfloat16):
    """One-time weight prep: PyTorch (out,in) -> (in,out) + cast to the MXU
    compute dtype; biases -> f32 rows.  Cache and reuse across forward calls."""
    prepared = []
    for w, b in params:
        prepared.append(jnp.asarray(w).T.astype(compute_dtype))
        prepared.append(jnp.asarray(b).reshape(1, -1).astype(jnp.float32))
    return tuple(prepared)


# ----------------------------- kernel ---------------------------------------

def mlp_block_kernel(x_ref,
                     w1_ref, b1_ref,
                     w2_ref, b2_ref,
                     w3_ref, b3_ref,
                     o_ref):
    """One batch tile: FC1 -> ReLU -> FC2 -> ReLU -> FC3 (bias, no final nl)."""
    # x arrives in its HBM source dtype; cast to the matmul dtype here (VPU cast
    # is free slot-wise and avoids an extra wrapper-side HBM pass).
    x = x_ref[...].astype(w1_ref.dtype)

    h = jnp.dot(x, w1_ref[...], preferred_element_type=jnp.float32) + b1_ref[...]
    h = jnp.maximum(h, 0.0)

    h = jnp.dot(h.astype(w2_ref.dtype), w2_ref[...],
                preferred_element_type=jnp.float32) + b2_ref[...]
    h = jnp.maximum(h, 0.0)

    h = jnp.dot(h.astype(w3_ref.dtype), w3_ref[...],
                preferred_element_type=jnp.float32) + b3_ref[...]

    # Plain path: o_ref is (tb, d_out) (reshape is a no-op).  Lane-dense path:
    # o_ref is (tb*d_out/128, 128) -> unmasked 128-lane stores.
    o_ref[...] = h.reshape(o_ref.shape).astype(o_ref.dtype)


# ----------------------------- wrapper --------------------------------------

def mlp_block_forward(x, params, *, tile_b=4096, compute_dtype=jnp.bfloat16,
                      lane_dense_out="auto", interpret=False):
    """Forward pass of MLP_Block(cfg=[d_in,d1,d2,d_out], 'RL').

    `params` is either the raw [(W,b)]*3 list (PyTorch (out,in) weights) or the
    output of prepare_mlp_params (preferred in a hot loop)."""
    if len(params) == 3:                       # raw pairs -> prepare on the fly
        params = prepare_mlp_params(params, compute_dtype)
    w1t, b1r, w2t, b2r, w3t, b3r = params

    d_in, d1 = w1t.shape
    d2, d_out = w3t.shape
    assert w2t.shape == (d1, d2) and x.shape[-1] == d_in

    out_dtype = x.dtype
    lead_shape = x.shape[:-1]
    x2 = x.reshape(-1, d_in)                   # fold NRI edges/timesteps into batch
    B = x2.shape[0]

    # --- generation-aware VMEM budget ---
    try:
        vmem_cap = int(pltpu.get_tpu_info().vmem_capacity_bytes)
    except Exception:
        vmem_cap = 64 * 1024 * 1024            # conservative (v7x per-TC)
    budget = int(0.55 * vmem_cap)

    def need(tb):
        n = 2 * _padded_bytes((tb, d_in), x2.dtype)           # x, double-buffered
        n += 2 * _padded_bytes((tb, d_out), jnp.float32)      # out, double-buffered
        for shp in ((d_in, d1), (d1, d2), (d2, d_out)):
            n += 2 * _padded_bytes(shp, compute_dtype)        # resident weights
        for d in (d1, d2, d_out):
            n += 2 * _padded_bytes((1, d), jnp.float32)       # resident biases
        n += 3 * _padded_bytes((tb, max(d1, d2, d_out)), jnp.float32)  # live h
        n += 2 * _padded_bytes((tb, max(d1, d2)), compute_dtype)       # bf16 copies
        return n

    # --- batch tile size ---
    cap_rows = max(8, int(tile_b))
    while cap_rows > 8 and need(cap_rows) > budget:
        cap_rows //= 2

    if B <= cap_rows:
        # Single tile == full array: no (8,128) constraint, no padding/slicing.
        # v7x: if the folded batch is big, split in two so both TCs get a tile.
        tb = B // 2 if (B >= 2048 and B % 16 == 0) else B
    else:
        tb = max(8, (cap_rows // 8) * 8)
        if B % tb != 0:
            # Prefer a tile that divides B exactly (avoids the full jnp.pad copy
            # and the trailing slice, each an extra HBM pass).
            for cand in range(tb, max(8, tb // 2) - 1, -8):
                if B % cand == 0:
                    tb = cand
                    break

    n_tiles = pl.cdiv(B, tb)
    B_pad = n_tiles * tb
    if B_pad != B:
        x2 = jnp.pad(x2, ((0, B_pad - B), (0, 0)))   # tail-only fallback
    grid = (n_tiles,)

    # --- lane-dense output eligibility ---
    rows_total = (B_pad * d_out) // 128
    rows_tile = (tb * d_out) // 128
    lane_ok = ((tb * d_out) % 128 == 0
               and (n_tiles == 1 or rows_tile % 8 == 0))
    if lane_dense_out == "auto":
        lane_modes = (True, False) if lane_ok else (False,)
    else:
        lane_modes = (bool(lane_dense_out),)
        if lane_modes[0] and not lane_ok:
            raise ValueError("lane_dense_out=True needs tb*d_out % 128 == 0 "
                             "(and 8-row tiles when multi-tile)")

    def resident(shape):
        # Full array, same block index every grid step -> VMEM-resident.
        # TODO(synk): pipeline_mode=pl.Buffered(1) would drop the unused second
        # buffer of these constant blocks (extra VMEM headroom on v7x).
        return pl.BlockSpec(shape, lambda i: (0,) * len(shape))

    vmem_limit = int(min(max(2 * need(tb), 16 * 1024 * 1024),
                         int(0.65 * vmem_cap)))

    def run(lane_dense):
        in_specs = [
            pl.BlockSpec((tb, d_in), lambda i: (i, 0)),
            resident(w1t.shape), resident(b1r.shape),
            resident(w2t.shape), resident(b2r.shape),
            resident(w3t.shape), resident(b3r.shape),
        ]
        if lane_dense:
            out_shape = jax.ShapeDtypeStruct((rows_total, 128), out_dtype)
            out_spec = pl.BlockSpec((rows_tile, 128), lambda i: (i, 0))
        else:
            out_shape = jax.ShapeDtypeStruct((B_pad, d_out), out_dtype)
            out_spec = pl.BlockSpec((tb, d_out), lambda i: (i, 0))

        out = pl.pallas_call(
            mlp_block_kernel,
            out_shape=out_shape,
            grid_spec=pl.GridSpec(grid=grid, in_specs=in_specs,
                                  out_specs=out_spec),
            compiler_params=pltpu.CompilerParams(
                dimension_semantics=("parallel",),
                vmem_limit_bytes=vmem_limit),
            interpret=interpret,
        )(x2, w1t, b1r, w2t, b2r, w3t, b3r)
        return out.reshape(B_pad, d_out)

    out, last_err = None, None
    for lane_dense in lane_modes:
        try:
            out = run(lane_dense)
            break
        except Exception as e:   # lane-dense reshape not lowerable -> plain path
            last_err = e
    if out is None:
        raise last_err

    if B_pad != B:
        out = out[:B]
    return out.reshape(*lead_shape, d_out)


# ----------------------------- references -----------------------------------

def init_linear(key, d_in, d_out, dtype=jnp.float32):
    """Deterministic PyTorch-like init: U(-1/sqrt(fan_in), 1/sqrt(fan_in))."""
    kw, kb = jax.random.split(key)
    bound = 1.0 / jnp.sqrt(jnp.asarray(d_in, dtype))
    w = jax.random.uniform(kw, (d_out, d_in), dtype, -bound, bound)
    b = jax.random.uniform(kb, (d_out,), dtype, -bound, bound)
    return w, b


def reference_forward_f32(x, params):
    """Pure-f32 JAX reference (matches PyTorch MLP_Block with nl_type='RL')."""
    (w1, b1), (w2, b2), (w3, b3) = params
    h = jnp.maximum(x @ w1.T + b1, 0.0)
    h = jnp.maximum(h @ w2.T + b2, 0.0)
    return h @ w3.T + b3


def reference_forward_mixed(x, params, compute_dtype):
    """Reference with the kernel's exact numerics: bf16 matmul inputs, f32 acc."""
    (w1, b1), (w2, b2), (w3, b3) = params

    def lin(h, w, b):
        return jnp.dot(h.astype(compute_dtype), w.T.astype(compute_dtype),
                       preferred_element_type=jnp.float32) + b

    h = jnp.maximum(lin(x, w1, b1), 0.0)
    h = jnp.maximum(lin(h, w2, b2), 0.0)
    return lin(h, w3, b3)


# ----------------------------- demo -----------------------------------------

if __name__ == "__main__":
    # MLP_Block(cfg=[16, 32, 32, 8], nl_type='RL', batch_norm=False,
    #           dropout=False, final_bias=True)
    cfg = [16, 32, 32, 8]
    batch = 32

    key = jax.random.PRNGKey(0)
    k_x, k1, k2, k3 = jax.random.split(key, 4)

    x = jax.random.normal(k_x, (batch, cfg[0]), jnp.float32)
    raw_params = [
        init_linear(k1, cfg[0], cfg[1]),
        init_linear(k2, cfg[1], cfg[2]),
        init_linear(k3, cfg[2], cfg[3]),
    ]

    # One-time weight prep (transpose + bf16 cast) reused across calls.
    prepared = prepare_mlp_params(raw_params, jnp.bfloat16)

    out = mlp_block_forward(x, prepared)
    out = jax.block_until_ready(out)
    assert out.shape == (batch, cfg[-1])

    # Tight check vs. a reference with identical numerics (bf16 matmul, f32 acc).
    ref_mixed = reference_forward_mixed(x, raw_params, jnp.bfloat16)
    assert jnp.allclose(out, ref_mixed, atol=1e-3, rtol=1e-3), \
        float(jnp.max(jnp.abs(out - ref_mixed)))

    # Loose sanity check vs. the full-f32 PyTorch-equivalent reference.
    ref_f32 = reference_forward_f32(x, raw_params)
    assert jnp.allclose(out, ref_f32, atol=1e-1, rtol=1e-1), \
        float(jnp.max(jnp.abs(out - ref_f32)))

    print("KERNEL_OK")
</pallas_src>

<mosaic_0001>
module attributes {stable_mosaic.version = 11 : i64} {
  func.func @mlp_block_kernel(%arg0: i32, %arg1: memref<32x16xf32, #tpu.memory_space<vmem>>, %arg2: memref<16x32xbf16, #tpu.memory_space<vmem>>, %arg3: memref<1x32xf32, #tpu.memory_space<vmem>>, %arg4: memref<32x32xbf16, #tpu.memory_space<vmem>>, %arg5: memref<1x32xf32, #tpu.memory_space<vmem>>, %arg6: memref<32x8xbf16, #tpu.memory_space<vmem>>, %arg7: memref<1x8xf32, #tpu.memory_space<vmem>>, %arg8: memref<2x128xf32, #tpu.memory_space<vmem>>) attributes {dimension_semantics = [#tpu.dimension_semantics<parallel>], iteration_bounds = array<i64: 1>, scalar_prefetch = 0 : i64, scratch_operands = 0 : i64, tpu.core_type = #tpu.core_type<tc>, window_params = [{transform_indices = @transform_0, window_bounds = array<i64: 32, 16>}, {pipeline_mode = #tpu.pipeline_mode<synchronous>, transform_indices = @transform_1, window_bounds = array<i64: 16, 32>}, {pipeline_mode = #tpu.pipeline_mode<synchronous>, transform_indices = @transform_2, window_bounds = array<i64: 1, 32>}, {pipeline_mode = #tpu.pipeline_mode<synchronous>, transform_indices = @transform_3, window_bounds = array<i64: 32, 32>}, {pipeline_mode = #tpu.pipeline_mode<synchronous>, transform_indices = @transform_4, window_bounds = array<i64: 1, 32>}, {pipeline_mode = #tpu.pipeline_mode<synchronous>, transform_indices = @transform_5, window_bounds = array<i64: 32, 8>}, {pipeline_mode = #tpu.pipeline_mode<synchronous>, transform_indices = @transform_6, window_bounds = array<i64: 1, 8>}, {transform_indices = @transform_7, window_bounds = array<i64: 2, 128>}]} {
    %c0 = arith.constant 0 : index
    %c0_0 = arith.constant 0 : index
    %0 = vector.load %arg1[%c0, %c0_0] : memref<32x16xf32, #tpu.memory_space<vmem>>, vector<32x16xf32>
    %1 = arith.truncf %0 : vector<32x16xf32> to vector<32x16xbf16>
    %c0_1 = arith.constant 0 : index
    %c0_2 = arith.constant 0 : index
    %2 = vector.load %arg2[%c0_1, %c0_2] : memref<16x32xbf16, #tpu.memory_space<vmem>>, vector<16x32xbf16>
    %cst = arith.constant dense<0.000000e+00> : vector<32x32xf32>
    %3 = tpu.matmul %1, %2, %cst {dimension_numbers = #tpu.dot_dimension_numbers<[1], [0], [0], [1], [0, 0, 1, 1], [], []>} : vector<32x16xbf16>, vector<16x32xbf16>, vector<32x32xf32> -> vector<32x32xf32>
    %c0_3 = arith.constant 0 : index
    %c0_4 = arith.constant 0 : index
    %4 = vector.load %arg3[%c0_3, %c0_4] : memref<1x32xf32, #tpu.memory_space<vmem>>, vector<1x32xf32>
    %5 = vector.broadcast %4 : vector<1x32xf32> to vector<32x32xf32>
    %6 = arith.addf %3, %5 : vector<32x32xf32>
    %cst_5 = arith.constant 0.000000e+00 : f32
    %7 = vector.broadcast %cst_5 : f32 to vector<32x32xf32>
    %8 = arith.maximumf %6, %7 : vector<32x32xf32>
    %9 = arith.truncf %8 : vector<32x32xf32> to vector<32x32xbf16>
    %c0_6 = arith.constant 0 : index
    %c0_7 = arith.constant 0 : index
    %10 = vector.load %arg4[%c0_6, %c0_7] : memref<32x32xbf16, #tpu.memory_space<vmem>>, vector<32x32xbf16>
    %cst_8 = arith.constant dense<0.000000e+00> : vector<32x32xf32>
    %11 = tpu.matmul %9, %10, %cst_8 {dimension_numbers = #tpu.dot_dimension_numbers<[1], [0], [0], [1], [0, 0, 1, 1], [], []>} : vector<32x32xbf16>, vector<32x32xbf16>, vector<32x32xf32> -> vector<32x32xf32>
    %c0_9 = arith.constant 0 : index
    %c0_10 = arith.constant 0 : index
    %12 = vector.load %arg5[%c0_9, %c0_10] : memref<1x32xf32, #tpu.memory_space<vmem>>, vector<1x32xf32>
    %13 = vector.broadcast %12 : vector<1x32xf32> to vector<32x32xf32>
    %14 = arith.addf %11, %13 : vector<32x32xf32>
    %cst_11 = arith.constant 0.000000e+00 : f32
    %15 = vector.broadcast %cst_11 : f32 to vector<32x32xf32>
    %16 = arith.maximumf %14, %15 : vector<32x32xf32>
    %17 = arith.truncf %16 : vector<32x32xf32> to vector<32x32xbf16>
    %c0_12 = arith.constant 0 : index
    %c0_13 = arith.constant 0 : index
    %18 = vector.load %arg6[%c0_12, %c0_13] : memref<32x8xbf16, #tpu.memory_space<vmem>>, vector<32x8xbf16>
    %cst_14 = arith.constant dense<0.000000e+00> : vector<32x8xf32>
    %19 = tpu.matmul %17, %18, %cst_14 {dimension_numbers = #tpu.dot_dimension_numbers<[1], [0], [0], [1], [0, 0, 1, 1], [], []>} : vector<32x32xbf16>, vector<32x8xbf16>, vector<32x8xf32> -> vector<32x8xf32>
    %c0_15 = arith.constant 0 : index
    %c0_16 = arith.constant 0 : index
    %20 = vector.load %arg7[%c0_15, %c0_16] : memref<1x8xf32, #tpu.memory_space<vmem>>, vector<1x8xf32>
    %21 = vector.broadcast %20 : vector<1x8xf32> to vector<32x8xf32>
    %22 = arith.addf %19, %21 : vector<32x8xf32>
    %23 = vector.shape_cast %22 : vector<32x8xf32> to vector<2x128xf32>
    %c0_17 = arith.constant 0 : index
    %c0_18 = arith.constant 0 : index
    %24 = vector.load %arg8[%c0_17, %c0_18] : memref<2x128xf32, #tpu.memory_space<vmem>>, vector<2x128xf32>
    tpu.vector_store %arg8[%c0_17, %c0_18], %23 {strides = array<i32>} : memref<2x128xf32, #tpu.memory_space<vmem>>, vector<2x128xf32>,
    return
  }
  func.func @transform_0(%arg0: i32) -> (i32, i32) {
    %c0_i32 = arith.constant 0 : i32
    %c0_i32_0 = arith.constant 0 : i32
    return %arg0, %c0_i32 : i32, i32
  }
  func.func @transform_1(%arg0: i32) -> (i32, i32) {
    %c0_i32 = arith.constant 0 : i32
    %c0_i32_0 = arith.constant 0 : i32
    %c0_i32_1 = arith.constant 0 : i32
    return %c0_i32, %c0_i32_0 : i32, i32
  }
  func.func @transform_2(%arg0: i32) -> (i32, i32) {
    %c0_i32 = arith.constant 0 : i32
    %c0_i32_0 = arith.constant 0 : i32
    %c0_i32_1 = arith.constant 0 : i32
    return %c0_i32, %c0_i32_0 : i32, i32
  }
  func.func @transform_3(%arg0: i32) -> (i32, i32) {
    %c0_i32 = arith.constant 0 : i32
    %c0_i32_0 = arith.constant 0 : i32
    %c0_i32_1 = arith.constant 0 : i32
    return %c0_i32, %c0_i32_0 : i32, i32
  }
  func.func @transform_4(%arg0: i32) -> (i32, i32) {
    %c0_i32 = arith.constant 0 : i32
    %c0_i32_0 = arith.constant 0 : i32
    %c0_i32_1 = arith.constant 0 : i32
    return %c0_i32, %c0_i32_0 : i32, i32
  }
  func.func @transform_5(%arg0: i32) -> (i32, i32) {
    %c0_i32 = arith.constant 0 : i32
    %c0_i32_0 = arith.constant 0 : i32
    %c0_i32_1 = arith.constant 0 : i32
    return %c0_i32, %c0_i32_0 : i32, i32
  }
  func.func @transform_6(%arg0: i32) -> (i32, i32) {
    %c0_i32 = arith.constant 0 : i32
    %c0_i32_0 = arith.constant 0 : i32
    %c0_i32_1 = arith.constant 0 : i32
    return %c0_i32, %c0_i32_0 : i32, i32
  }
  func.func @transform_7(%arg0: i32) -> (i32, i32) {
    %c0_i32 = arith.constant 0 : i32
    %c0_i32_0 = arith.constant 0 : i32
    return %arg0, %c0_i32 : i32, i32
  }
}

module attributes {stable_mosaic.version = 11 : i64} {
  func.func @mlp_block_kernel(%arg0: i32, %arg1: memref<32x16xf32, #tpu.memory_space<vmem>>, %arg2: memref<16x32xbf16, #tpu.memory_space<vmem>>, %arg3: memref<1x32xf32, #tpu.memory_space<vmem>>, %arg4: memref<32x32xbf16, #tpu.memory_space<vmem>>, %arg5: memref<1x32xf32, #tpu.memory_space<vmem>>, %arg6: memref<32x8xbf16, #tpu.memory_space<vmem>>, %arg7: memref<1x8xf32, #tpu.memory_space<vmem>>, %arg8: memref<32x8xf32, #tpu.memory_space<vmem>>) attributes {dimension_semantics = [#tpu.dimension_semantics<parallel>], iteration_bounds = array<i64: 1>, scalar_prefetch = 0 : i64, scratch_operands = 0 : i64, tpu.core_type = #tpu.core_type<tc>, window_params = [{transform_indices = @transform_0, window_bounds = array<i64: 32, 16>}, {pipeline_mode = #tpu.pipeline_mode<synchronous>, transform_indices = @transform_1, window_bounds = array<i64: 16, 32>}, {pipeline_mode = #tpu.pipeline_mode<synchronous>, transform_indices = @transform_2, window_bounds = array<i64: 1, 32>}, {pipeline_mode = #tpu.pipeline_mode<synchronous>, transform_indices = @transform_3, window_bounds = array<i64: 32, 32>}, {pipeline_mode = #tpu.pipeline_mode<synchronous>, transform_indices = @transform_4, window_bounds = array<i64: 1, 32>}, {pipeline_mode = #tpu.pipeline_mode<synchronous>, transform_indices = @transform_5, window_bounds = array<i64: 32, 8>}, {pipeline_mode = #tpu.pipeline_mode<synchronous>, transform_indices = @transform_6, window_bounds = array<i64: 1, 8>}, {transform_indices = @transform_7, window_bounds = array<i64: 32, 8>}]} {
    %c0 = arith.constant 0 : index
    %c0_0 = arith.constant 0 : index
    %0 = vector.load %arg1[%c0, %c0_0] : memref<32x16xf32, #tpu.memory_space<vmem>>, vector<32x16xf32>
    %1 = arith.truncf %0 : vector<32x16xf32> to vector<32x16xbf16>
    %c0_1 = arith.constant 0 : index
    %c0_2 = arith.constant 0 : index
    %2 = vector.load %arg2[%c0_1, %c0_2] : memref<16x32xbf16, #tpu.memory_space<vmem>>, vector<16x32xbf16>
    %cst = arith.constant dense<0.000000e+00> : vector<32x32xf32>
    %3 = tpu.matmul %1, %2, %cst {dimension_numbers = #tpu.dot_dimension_numbers<[1], [0], [0], [1], [0, 0, 1, 1], [], []>} : vector<32x16xbf16>, vector<16x32xbf16>, vector<32x32xf32> -> vector<32x32xf32>
    %c0_3 = arith.constant 0 : index
    %c0_4 = arith.constant 0 : index
    %4 = vector.load %arg3[%c0_3, %c0_4] : memref<1x32xf32, #tpu.memory_space<vmem>>, vector<1x32xf32>
    %5 = vector.broadcast %4 : vector<1x32xf32> to vector<32x32xf32>
    %6 = arith.addf %3, %5 : vector<32x32xf32>
    %cst_5 = arith.constant 0.000000e+00 : f32
    %7 = vector.broadcast %cst_5 : f32 to vector<32x32xf32>
    %8 = arith.maximumf %6, %7 : vector<32x32xf32>
    %9 = arith.truncf %8 : vector<32x32xf32> to vector<32x32xbf16>
    %c0_6 = arith.constant 0 : index
    %c0_7 = arith.constant 0 : index
    %10 = vector.load %arg4[%c0_6, %c0_7] : memref<32x32xbf16, #tpu.memory_space<vmem>>, vector<32x32xbf16>
    %cst_8 = arith.constant dense<0.000000e+00> : vector<32x32xf32>
    %11 = tpu.matmul %9, %10, %cst_8 {dimension_numbers = #tpu.dot_dimension_numbers<[1], [0], [0], [1], [0, 0, 1, 1], [], []>} : vector<32x32xbf16>, vector<32x32xbf16>, vector<32x32xf32> -> vector<32x32xf32>
    %c0_9 = arith.constant 0 : index
    %c0_10 = arith.constant 0 : index
    %12 = vector.load %arg5[%c0_9, %c0_10] : memref<1x32xf32, #tpu.memory_space<vmem>>, vector<1x32xf32>
    %13 = vector.broadcast %12 : vector<1x32xf32> to vector<32x32xf32>
    %14 = arith.addf %11, %13 : vector<32x32xf32>
    %cst_11 = arith.constant 0.000000e+00 : f32
    %15 = vector.broadcast %cst_11 : f32 to vector<32x32xf32>
    %16 = arith.maximumf %14, %15 : vector<32x32xf32>
    %17 = arith.truncf %16 : vector<32x32xf32> to vector<32x32xbf16>
    %c0_12 = arith.constant 0 : index
    %c0_13 = arith.constant 0 : index
    %18 = vector.load %arg6[%c0_12, %c0_13] : memref<32x8xbf16, #tpu.memory_space<vmem>>, vector<32x8xbf16>
    %cst_14 = arith.constant dense<0.000000e+00> : vector<32x8xf32>
    %19 = tpu.matmul %17, %18, %cst_14 {dimension_numbers = #tpu.dot_dimension_numbers<[1], [0], [0], [1], [0, 0, 1, 1], [], []>} : vector<32x32xbf16>, vector<32x8xbf16>, vector<32x8xf32> -> vector<32x8xf32>
    %c0_15 = arith.constant 0 : index
    %c0_16 = arith.constant 0 : index
    %20 = vector.load %arg7[%c0_15, %c0_16] : memref<1x8xf32, #tpu.memory_space<vmem>>, vector<1x8xf32>
    %21 = vector.broadcast %20 : vector<1x8xf32> to vector<32x8xf32>
    %22 = arith.addf %19, %21 : vector<32x8xf32>
    %c0_17 = arith.constant 0 : index
    %c0_18 = arith.constant 0 : index
    %23 = vector.load %arg8[%c0_17, %c0_18] : memref<32x8xf32, #tpu.memory_space<vmem>>, vector<32x8xf32>
    tpu.vector_store %arg8[%c0_17, %c0_18], %22 {strides = array<i32>} : memref<32x8xf32, #tpu.memory_space<vmem>>, vector<32x8xf32>,
    return
  }
  func.func @transform_0(%arg0: i32) -> (i32, i32) {
    %c0_i32 = arith.constant 0 : i32
    %c0_i32_0 = arith.constant 0 : i32
    return %arg0, %c0_i32 : i32, i32
  }
  func.func @transform_1(%arg0: i32) -> (i32, i32) {
    %c0_i32 = arith.constant 0 : i32
    %c0_i32_0 = arith.constant 0 : i32
    %c0_i32_1 = arith.constant 0 : i32
    return %c0_i32, %c0_i32_0 : i32, i32
  }
  func.func @transform_2(%arg0: i32) -> (i32, i32) {
    %c0_i32 = arith.constant 0 : i32
    %c0_i32_0 = arith.constant 0 : i32
    %c0_i32_1 = arith.constant 0 : i32
    return %c0_i32, %c0_i32_0 : i32, i32
  }
  func.func @transform_3(%arg0: i32) -> (i32, i32) {
    %c0_i32 = arith.constant 0 : i32
    %c0_i32_0 = arith.constant 0 : i32
    %c0_i32_1 = arith.constant 0 : i32
    return %c0_i32, %c0_i32_0 : i32, i32
  }
  func.func @transform_4(%arg0: i32) -> (i32, i32) {
    %c0_i32 = arith.constant 0 : i32
    %c0_i32_0 = arith.constant 0 : i32
    %c0_i32_1 = arith.constant 0 : i32
    return %c0_i32, %c0_i32_0 : i32, i32
  }
  func.func @transform_5(%arg0: i32) -> (i32, i32) {
    %c0_i32 = arith.constant 0 : i32
    %c0_i32_0 = arith.constant 0 : i32
    %c0_i32_1 = arith.constant 0 : i32
    return %c0_i32, %c0_i32_0 : i32, i32
  }
  func.func @transform_6(%arg0: i32) -> (i32, i32) {
    %c0_i32 = arith.constant 0 : i32
    %c0_i32_0 = arith.constant 0 : i32
    %c0_i32_1 = arith.constant 0 : i32
    return %c0_i32, %c0_i32_0 : i32, i32
  }
  func.func @transform_7(%arg0: i32) -> (i32, i32) {
    %c0_i32 = arith.constant 0 : i32
    %c0_i32_0 = arith.constant 0 : i32
    return %arg0, %c0_i32 : i32, i32
  }
}

</mosaic_0001>

<bundles_post_ra>
// kernel: tpu_custom_call.1
= control target key start
LH: loop header
LB: loop body
LE: loop exit
PB: predicated region body
PF: predicated region fallthrough
CT: control target
= control target key end

     0   :  { %vm45_vm0 = vcmask 130048   ;;  %vm97_vm1 = vcmask 261120   ;;  %vm174_vm2 = vcmask 64512   ;;  %s311_s1 = inlined_call_operand.vmem [shape: bf16[16,32], index: 1, kind: input, shape index: {}]   ;;  %s312_s0 = inlined_call_operand.vmem [shape: f32[32,16], index: 0, kind: input, shape index: {}]   ;;  %s313_s2 = inlined_call_operand.vmem [shape: f32[1,32], index: 2, kind: input, shape index: {}]   ;;  %s314_s4 = inlined_call_operand.vmem [shape: f32[1,32], index: 4, kind: input, shape index: {}]   ;;  %s315_s3 = inlined_call_operand.vmem [shape: bf16[32,32], index: 3, kind: input, shape index: {}]   ;;  %s316_s6 = inlined_call_operand.vmem [shape: f32[1,8], index: 6, kind: input, shape index: {}]   ;;  %s317_s5 = inlined_call_operand.vmem [shape: bf16[32,8], index: 5, kind: input, shape index: {}]   ;;  %s318_s7 = inlined_call_operand.vmem [shape: f32[32,8], index: 7, kind: output, shape index: {}]  }
   0x1   :  { %v209_v0 = vld [vmem:[%s311_s1] sm:$0xff]  ;;  %v28_v2 = vld [vmem:[%s312_s0 + $0x8] sm:$0xff]  ;;  %v29_v4 = vld [vmem:[%s312_s0 + $0x10] sm:$0xff] }
   0x2   :  { %v27_v1 = vld [vmem:[%s312_s0] sm:$0xff]  ;;  %59 = vmatpush.bf16.msra.mxu0 %v209_v0  ;;  %v30_v5 = vld [vmem:[%s312_s0 + $0x18] sm:$0xff]  ;;  %v211_v7 = vld [vmem:[%s315_s3 + $0x8] sm:$0xff] }
   0x3   :  { %v31_v3 = vpack.c.bf16 %v28_v2, %v27_v1  ;;  %v32_v6 = vpack.c.bf16 %v30_v5, %v29_v4  ;;  %110 = vmatpush.bf16.msra.mxu1 %v211_v7  ;;  %214 = vmatpush.bf16.msra.mxu3 %v211_v7  ;;  %v210_v8 = vld [vmem:[%s315_s3] sm:$0xff]  ;;  %v213_v24 = vld [vmem:[%s317_s5 + $0x8] sm:$0xff] }
   0x4   :  { %v216_v10 = vld [vmem:[%s313_s2] ss:$0 sm:$0xff]  ;;  %161 = vmatpush.bf16.msra.mxu2 %v213_v24 }
   0x5   :  { %187 = vmatmul.msk.bf16.vlgmr.msra.gmra.mxu0 %vm45_vm0, %v31_v3  ;;  %v212_v25 = vld [vmem:[%s317_s5] sm:$0xff] }
   0x6   :  { %v217_v27 = vld [vmem:[%s314_s4] ss:$0 sm:$0xff] }
   0x7   :  { %111 = vmatpush.bf16.msra.mxu1 %v210_v8  ;;  %215 = vmatpush.bf16.msra.mxu3 %v210_v8  ;;  %v218_v41 = vld [vmem:[%s316_s6] ss:$0 sm:$0xff] }
   0x8   :  { %162 = vmatpush.bf16.msra.mxu2 %v212_v25 }
  0x15   :  { %188 = vmatmul.msk.bf16.gmra.mxu0 %vm45_vm0, %v32_v6 }
  0x82   :  { %v61_v9 = vpop.f32.mrf.mxu0 }
  0x83   :  { %v62_v11 = vadd.f32 %v216_v10, %v61_v9 }
  0x85   :  { %v71_v14 = vmax.f32 %v62_v11, 0.0 }
  0x8a   :  { %v63_v12 = vpop.f32.mrf.mxu0 }
  0x8b   :  { %v64_v13 = vadd.f32 %v216_v10, %v63_v12 }
  0x8d   :  { %v72_v15 = vmax.f32 %v64_v13, 0.0 }
  0x8f   :  { %v75_v16 = vpack.c.bf16 %v72_v15, %v71_v14 }
  0x91   :  { %197 = vmatmul.msk.bf16.vlgmr.msra.gmra.mxu1 %vm97_vm1, %v75_v16 }
  0x92   :  { %v66_v17 = vpop.f32.mrf.mxu0 }
  0x93   :  { %v67_v18 = vadd.f32 %v216_v10, %v66_v17 }
  0x95   :  { %v73_v21 = vmax.f32 %v67_v18, 0.0 }
  0x9a   :  { %v68_v19 = vpop.f32.mrf.mxu0 }
  0x9b   :  { %v69_v20 = vadd.f32 %v216_v10, %v68_v19 }
  0x9d   :  { %v74_v22 = vmax.f32 %v69_v20, 0.0 }
  0x9f   :  { %v76_v23 = vpack.c.bf16 %v74_v22, %v73_v21 }
  0xa1   :  { %198 = vmatmul.msk.bf16.vlgmr.msra.gmra.mxu3 %vm97_vm1, %v76_v23 }
 0x10e   :  { %v113_v26 = vpop.f32.mrf.mxu1 }
 0x10f   :  { %v114_v28 = vadd.f32 %v217_v27, %v113_v26 }
 0x111   :  { %v123_v31 = vmax.f32 %v114_v28, 0.0 }
 0x116   :  { %v115_v29 = vpop.f32.mrf.mxu1 }
 0x117   :  { %v116_v30 = vadd.f32 %v217_v27, %v115_v29 }
 0x119   :  { %v124_v32 = vmax.f32 %v116_v30, 0.0 }
 0x11b   :  { %v127_v33 = vpack.c.bf16 %v124_v32, %v123_v31 }
 0x11d   :  { %207 = vmatmul.msk.bf16.vlgmr.msra.gmra.mxu2 %vm97_vm1, %v127_v33 }
 0x124   :  { %v118_v34 = vpop.f32.mrf.mxu3 }
 0x125   :  { %v119_v35 = vadd.f32 %v217_v27, %v118_v34 }
 0x127   :  { %v125_v38 = vmax.f32 %v119_v35, 0.0 }
 0x12c   :  { %v120_v36 = vpop.f32.mrf.mxu3 }
 0x12d   :  { %v121_v37 = vadd.f32 %v217_v27, %v120_v36 }
 0x12f   :  { %v126_v39 = vmax.f32 %v121_v37, 0.0 }
 0x131   :  { %v128_v40 = vpack.c.bf16 %v126_v39, %v125_v38 }
 0x133   :  { %208 = vmatmul.msk.bf16.gmra.mxu2 %vm97_vm1, %v128_v40 }
 0x1a0   :  { %v164_v42 = vpop.f32.mrf.mxu2 }
 0x1a1   :  { %v165_v43 = vadd.f32 %v218_v41, %v164_v42 }
 0x1a3   :  { %175 = vst.msk [vmem:[%s318_s7] sm:$0xff] %vm174_vm2, %v165_v43 }
 0x1a8   :  { %v166_v44 = vpop.f32.mrf.mxu2 }
 0x1a9   :  { %v167_v45 = vadd.f32 %v218_v41, %v166_v44 }
 0x1ab   :  { %176 = vst.msk [vmem:[%s318_s7 + $0x8] sm:$0xff] %vm174_vm2, %v167_v45 }
 0x1b6   :  { %v169_v46 = vpop.f32.mrf.mxu2 }
 0x1b7   :  { %v170_v47 = vadd.f32 %v218_v41, %v169_v46 }
 0x1b9   :  { %177 = vst.msk [vmem:[%s318_s7 + $0x10] sm:$0xff] %vm174_vm2, %v170_v47 }
 0x1be   :  { %v171_v48 = vpop.f32.mrf.mxu2 }
 0x1bf   :  { %v172_v49 = vadd.f32 %v218_v41, %v171_v48 }
 0x1c1   :  { %178 = vst.msk [vmem:[%s318_s7 + $0x18] sm:$0xff] %vm174_vm2, %v172_v49 }

</bundles_post_ra>
